<compile_context>
chip_gen: v6e
topology: v6e:2x2x1
jax: 0.10.0
libtpu: 0.0.40
codegen_flags: <defaults>
</compile_context>

<pallas_src>
import numpy as np
import jax
import jax.numpy as jnp
from jax.experimental import pallas as pl
from jax.experimental.pallas import tpu as pltpu

PI = np.pi


def _round_up(x, m):
    return ((x + m - 1) // m) * m


# ----------------------------- Pallas kernels -----------------------------

def _packed_dft_kernel(x2_ref, w2_ref, y2_ref):
    """y2 = x2 @ W2 : packed complex DFT, single lane-dense MXU matmul."""
    y2_ref[...] = jnp.dot(x2_ref[...], w2_ref[...],
                          preferred_element_type=jnp.float32)


def _packed_dft_noise_kernel(x2_ref, n2_ref, w2_ref, y2_ref):
    """y2 = (x2 + noise2) @ W2 : fused AWGN add + packed complex DFT."""
    y2_ref[...] = jnp.dot(x2_ref[...] + n2_ref[...], w2_ref[...],
                          preferred_element_type=jnp.float32)


def _make_fir_kernel(L, lout_pad):
    """L-tap complex FIR (full linear convolution) on the VPU.

    spr/spi : (TB, LP)    signal planes, L-1 leading zeros, zero tail
    cr/ci   : (TB, L)     per-row complex taps
    or/oi   : (TB, lout_pad) convolution output planes (lane-dense)
    """
    def kernel(spr_ref, spi_ref, cr_ref, ci_ref, or_ref, oi_ref):
        spr = spr_ref[...]
        spi = spi_ref[...]
        cr_all = cr_ref[...]
        ci_all = ci_ref[...]
        acc_r = jnp.zeros(or_ref.shape, jnp.float32)
        acc_i = jnp.zeros(oi_ref.shape, jnp.float32)
        for l in range(L):                       # static unroll, L is small
            s = L - 1 - l
            sr = spr[:, s:s + lout_pad]          # shifted signal (lane slice)
            si = spi[:, s:s + lout_pad]
            cr = cr_all[:, l:l + 1]              # (TB, 1) tap, lane-broadcast
            ci = ci_all[:, l:l + 1]
            acc_r = acc_r + cr * sr - ci * si
            acc_i = acc_i + cr * si + ci * sr
        or_ref[...] = acc_r
        oi_ref[...] = acc_i
    return kernel


# ------------------------------ glue helpers ------------------------------

def _packed_dft_mats(M):
    """Packed block matrices for torch.fft / torch.ifft conventions."""
    k = np.arange(M)
    ang = 2.0 * PI * np.outer(k, k) / M
    c, s = np.cos(ang), np.sin(ang)
    # forward fft: W = exp(-i ang) -> Wr=c, Wi=-s ; W2 = [[Wr, Wi], [-Wi, Wr]]
    w2_fft = np.block([[c, -s], [s, c]]).astype(np.float32)
    # inverse fft: W = exp(+i ang)/M
    w2_ifft = (np.block([[c, s], [-s, c]]) / M).astype(np.float32)
    return jnp.asarray(w2_fft), jnp.asarray(w2_ifft)


def _packed_dft(x2, w2, noise2=None):
    """x2: (B, 2M) packed [real | imag] rows; returns (B, 2M) = (x2[+n2]) @ W2."""
    B, twoM = x2.shape
    TB = 128 if B > 128 else _round_up(B, 8)
    B_pad = _round_up(B, TB)
    if B_pad != B:
        pad = ((0, B_pad - B), (0, 0))
        x2 = jnp.pad(x2, pad)
        if noise2 is not None:
            noise2 = jnp.pad(noise2, pad)

    x_spec = pl.BlockSpec((TB, twoM), lambda i: (i, 0))
    w_spec = pl.BlockSpec((twoM, twoM), lambda i: (0, 0))
    out_spec = pl.BlockSpec((TB, twoM), lambda i: (i, 0))
    params = pltpu.CompilerParams(dimension_semantics=("parallel",))

    if noise2 is None:
        y2 = pl.pallas_call(
            _packed_dft_kernel,
            out_shape=jax.ShapeDtypeStruct((B_pad, twoM), jnp.float32),
            grid=(B_pad // TB,),
            in_specs=[x_spec, w_spec],
            out_specs=out_spec,
            compiler_params=params,
        )(x2, w2)
    else:
        y2 = pl.pallas_call(
            _packed_dft_noise_kernel,
            out_shape=jax.ShapeDtypeStruct((B_pad, twoM), jnp.float32),
            grid=(B_pad // TB,),
            in_specs=[x_spec, x_spec, w_spec],
            out_specs=out_spec,
            compiler_params=params,
        )(x2, noise2, w2)
    return y2[:B]


def _dft_planes(xr, xi, w2, nr=None, ni=None):
    """Apply packed complex DFT to split real/imag planes of shape (..., M)."""
    shape = xr.shape
    M = shape[-1]
    B = int(np.prod(shape[:-1]))
    x2 = jnp.concatenate(
        [xr.reshape(B, M).astype(jnp.float32),
         xi.reshape(B, M).astype(jnp.float32)], axis=-1)
    n2 = None
    if nr is not None:
        n2 = jnp.concatenate(
            [nr.reshape(B, M).astype(jnp.float32),
             ni.reshape(B, M).astype(jnp.float32)], axis=-1)
    y2 = _packed_dft(x2, w2, n2)
    return y2[:, :M].reshape(shape), y2[:, M:].reshape(shape)


def _channel_fir(sig_r, sig_i, cof_r, cof_i, L):
    """Full complex linear convolution of (N,P,SMK) planes with L taps."""
    N, P, SMK = sig_r.shape
    B = N * P
    Lout = SMK + L - 1
    lout_pad = _round_up(Lout, 128)
    LP = _round_up(L - 1 + lout_pad, 128)
    TB = 8
    B_pad = _round_up(B, TB)

    def pad_sig(s):
        sp = jnp.zeros((B_pad, LP), jnp.float32)
        return sp.at[:B, L - 1:L - 1 + SMK].set(s.reshape(B, SMK))

    def pad_cof(c):
        cp = jnp.zeros((B_pad, L), jnp.float32)
        return cp.at[:B].set(c.reshape(B, L))

    spr, spi = pad_sig(sig_r), pad_sig(sig_i)
    cr, ci = pad_cof(cof_r), pad_cof(cof_i)

    out_r, out_i = pl.pallas_call(
        _make_fir_kernel(L, lout_pad),
        out_shape=(jax.ShapeDtypeStruct((B_pad, lout_pad), jnp.float32),
                   jax.ShapeDtypeStruct((B_pad, lout_pad), jnp.float32)),
        grid=(B_pad // TB,),
        in_specs=[pl.BlockSpec((TB, LP), lambda b: (b, 0)),
                  pl.BlockSpec((TB, LP), lambda b: (b, 0)),
                  pl.BlockSpec((TB, L), lambda b: (b, 0)),
                  pl.BlockSpec((TB, L), lambda b: (b, 0))],
        out_specs=(pl.BlockSpec((TB, lout_pad), lambda b: (b, 0)),
                   pl.BlockSpec((TB, lout_pad), lambda b: (b, 0))),
        compiler_params=pltpu.CompilerParams(
            dimension_semantics=("parallel",)),
    )(spr, spi, cr, ci)
    return (out_r[:B, :Lout].reshape(N, P, Lout),
            out_i[:B, :Lout].reshape(N, P, Lout))


def _add_cp_plane(x, K):
    return jnp.concatenate([x[..., -K:], x], axis=-1)


def _normalize(x, pwr=1.0):
    power = jnp.mean(x ** 2, axis=(-2, -1), keepdims=True)
    alpha = np.sqrt(pwr / 2) / jnp.sqrt(power)
    return alpha * x, alpha


# ----------------------------- OFDM channel -------------------------------

class OFDMChannelPallas:
    """JAX/Pallas port of OFDM_channel (default path: A=None, Ang=None, isTest=False)."""

    def __init__(self, N, P, S, M, K, L, SNR=20, pwr=1.0, pilot_key=None):
        self.N, self.P, self.S, self.M, self.K, self.L = N, P, S, M, K, L
        self.SNR, self.pwr = SNR, pwr
        # TODO(synk): Clip (A is not None), Add_CFO (Ang is not None) and the
        # isTest power-tracking branch are not implemented (module defaults used).
        self.w2_fft, self.w2_ifft = _packed_dft_mats(M)

        decay = L // 2
        power = np.exp(-np.arange(L, dtype=np.float64) / decay)
        power = power / power.sum()
        self.cof_scale = jnp.asarray(
            np.sqrt(power / 2.0), jnp.float32).reshape(1, 1, L, 1)

        # pilot = add_cp(ifft(Normalize(randn(N, P, 1, M, 2))))
        pilot = jax.random.normal(pilot_key, (N, P, 1, M, 2), jnp.float32)
        pilot, _ = _normalize(pilot, pwr)
        pr, pi_ = _dft_planes(pilot[..., 0], pilot[..., 1], self.w2_ifft)
        self.pilot_r = _add_cp_plane(pr, K)   # (N, P, 1, M+K)
        self.pilot_i = _add_cp_plane(pi_, K)

    def __call__(self, x, key, SNR=None, cof=None):
        N, P, S, M, K, L = self.N, self.P, self.S, self.M, self.K, self.L
        k_cof, k_noise = jax.random.split(key)
        SMK = (S + 1) * (M + K)

        # ifft over subcarriers (packed complex matmul), add CP, prepend pilot.
        xr, xi = _dft_planes(x[..., 0], x[..., 1], self.w2_ifft)   # (N,P,S,M)
        xr = _add_cp_plane(xr, K)                                  # (N,P,S,M+K)
        xi = _add_cp_plane(xi, K)
        sig_r = jnp.concatenate([self.pilot_r, xr], axis=2).reshape(N, P, SMK)
        sig_i = jnp.concatenate([self.pilot_i, xi], axis=2).reshape(N, P, SMK)

        # multipath taps
        if cof is None:
            cof = self.cof_scale * jax.random.normal(
                k_cof, (N, P, L, 2), jnp.float32)
        cof = cof.astype(jnp.float32)
        cof_r, cof_i = cof[..., 0], cof[..., 1]

        # L-tap complex FIR channel (full linear convolution) in Pallas.
        y_r, y_i = _channel_fir(sig_r, sig_i, cof_r, cof_i, L)
        out_r = y_r[:, :, :SMK].reshape(N, P, S + 1, M + K)
        out_i = y_i[:, :, :SMK].reshape(N, P, S + 1, M + K)

        # AWGN (only the non-CP part survives rm_cp; folded into epilogue DFT).
        snr = self.SNR if SNR is None else SNR
        noise_pwr = self.pwr / (M * 10.0 ** (0.1 * snr))
        noise = np.sqrt(noise_pwr / 2.0) * jax.random.normal(
            k_noise, (N, P, S + 1, M + K, 2), jnp.float32)

        # Fused epilogue: one packed-DFT call over
        #   [ rm_cp(frame rows)  ;  zero-padded channel taps (H_true rows) ]
        # with the noise add done inside the kernel (zero noise for H rows).
        B2 = N * P * (S + 1)
        BH = N * P
        fr = out_r[..., K:].reshape(B2, M)
        fi = out_i[..., K:].reshape(B2, M)
        nr = noise[..., K:, 0].reshape(B2, M)
        ni = noise[..., K:, 1].reshape(B2, M)
        hzr = jnp.concatenate(
            [cof_r.reshape(BH, L), jnp.zeros((BH, M - L), jnp.float32)], axis=-1)
        hzi = jnp.concatenate(
            [cof_i.reshape(BH, L), jnp.zeros((BH, M - L), jnp.float32)], axis=-1)

        xr_all = jnp.concatenate([fr, hzr], axis=0)
        xi_all = jnp.concatenate([fi, hzi], axis=0)
        nr_all = jnp.concatenate([nr, jnp.zeros((BH, M), jnp.float32)], axis=0)
        ni_all = jnp.concatenate([ni, jnp.zeros((BH, M), jnp.float32)], axis=0)

        yr, yi = _dft_planes(xr_all, xi_all, self.w2_fft, nr_all, ni_all)

        info = jnp.stack([yr[:B2].reshape(N, P, S + 1, M),
                          yi[:B2].reshape(N, P, S + 1, M)], axis=-1)
        info_pilot = info[:, :, 0:1]
        info_sig = info[:, :, 1:]
        H_true = jnp.stack([yr[B2:].reshape(N, P, M),
                            yi[B2:].reshape(N, P, M)], axis=-1)
        return info_pilot, info_sig, H_true, noise_pwr


if __name__ == "__main__":
    # N batch, P antennas, S symbols, M subcarriers, K cyclic prefix, L taps.
    N, P, S, M, K, L = 2, 1, 2, 64, 16, 8

    key = jax.random.PRNGKey(0)
    k_pilot, k_x, k_fwd = jax.random.split(key, 3)

    mod = OFDMChannelPallas(N, P, S, M, K, L, SNR=20, pwr=1.0, pilot_key=k_pilot)
    x = jax.random.normal(k_x, (N, P, S, M, 2), jnp.float32)

    info_pilot, info_sig, H_true, noise_pwr = mod(x, k_fwd)
    jax.block_until_ready((info_pilot, info_sig, H_true))

    assert info_pilot.shape == (N, P, 1, M, 2)
    assert info_sig.shape == (N, P, S, M, 2)
    assert H_true.shape == (N, P, M, 2)
    assert np.isfinite(np.asarray(info_sig)).all()

    # Spot-check 1: FIR channel kernel vs numpy full complex convolution.
    rs = np.random.RandomState(0)
    ts_r = rs.randn(N, P, 37).astype(np.float32)
    ts_i = rs.randn(N, P, 37).astype(np.float32)
    tc_r = rs.randn(N, P, L).astype(np.float32)
    tc_i = rs.randn(N, P, L).astype(np.float32)
    fr_t, fi_t = _channel_fir(jnp.asarray(ts_r), jnp.asarray(ts_i),
                              jnp.asarray(tc_r), jnp.asarray(tc_i), L)
    fr_t, fi_t = np.asarray(fr_t), np.asarray(fi_t)
    for n in range(N):
        for p in range(P):
            ref = np.convolve(ts_r[n, p] + 1j * ts_i[n, p],
                              tc_r[n, p] + 1j * tc_i[n, p])
            assert np.allclose(fr_t[n, p] + 1j * fi_t[n, p], ref, atol=1e-3)

    # Spot-check 2: H_true (packed DFT) vs numpy FFT for a fixed cof.
    cof_np = 0.1 * rs.randn(N, P, L, 2).astype(np.float32)
    _, _, H2, _ = mod(x, k_fwd, cof=jnp.asarray(cof_np))
    H2 = np.asarray(H2)
    H_ref = np.fft.fft(cof_np[..., 0] + 1j * cof_np[..., 1], n=M, axis=-1)
    assert np.allclose(H2[..., 0] + 1j * H2[..., 1], H_ref, atol=1e-3)

    print("KERNEL_OK")
</pallas_src>

<mosaic_0001>
module attributes {stable_mosaic.version = 11 : i64} {
  func.func @_packed_dft_kernel(%arg0: i32, %arg1: memref<8x128xf32, #tpu.memory_space<vmem>>, %arg2: memref<128x128xf32, #tpu.memory_space<vmem>>, %arg3: memref<8x128xf32, #tpu.memory_space<vmem>>) attributes {dimension_semantics = [#tpu.dimension_semantics<parallel>], iteration_bounds = array<i64: 1>, scalar_prefetch = 0 : i64, scratch_operands = 0 : i64, tpu.core_type = #tpu.core_type<tc>, window_params = [{transform_indices = @transform_0, window_bounds = array<i64: 8, 128>}, {pipeline_mode = #tpu.pipeline_mode<synchronous>, transform_indices = @transform_1, window_bounds = array<i64: 128, 128>}, {transform_indices = @transform_2, window_bounds = array<i64: 8, 128>}]} {
    %c0 = arith.constant 0 : index
    %c0_0 = arith.constant 0 : index
    %0 = vector.load %arg1[%c0, %c0_0] : memref<8x128xf32, #tpu.memory_space<vmem>>, vector<8x128xf32>
    %c0_1 = arith.constant 0 : index
    %c0_2 = arith.constant 0 : index
    %1 = vector.load %arg2[%c0_1, %c0_2] : memref<128x128xf32, #tpu.memory_space<vmem>>, vector<128x128xf32>
    %cst = arith.constant dense<0.000000e+00> : vector<8x128xf32>
    %2 = tpu.matmul %0, %1, %cst {dimension_numbers = #tpu.dot_dimension_numbers<[1], [0], [0], [1], [0, 0, 1, 1], [], []>} : vector<8x128xf32>, vector<128x128xf32>, vector<8x128xf32> -> vector<8x128xf32>
    %c0_3 = arith.constant 0 : index
    %c0_4 = arith.constant 0 : index
    %3 = vector.load %arg3[%c0_3, %c0_4] : memref<8x128xf32, #tpu.memory_space<vmem>>, vector<8x128xf32>
    tpu.vector_store %arg3[%c0_3, %c0_4], %2 {strides = array<i32>} : memref<8x128xf32, #tpu.memory_space<vmem>>, vector<8x128xf32>,
    return
  }
  func.func @transform_0(%arg0: i32) -> (i32, i32) {
    %c0_i32 = arith.constant 0 : i32
    %c0_i32_0 = arith.constant 0 : i32
    return %arg0, %c0_i32 : i32, i32
  }
  func.func @transform_1(%arg0: i32) -> (i32, i32) {
    %c0_i32 = arith.constant 0 : i32
    %c0_i32_0 = arith.constant 0 : i32
    %c0_i32_1 = arith.constant 0 : i32
    return %c0_i32, %c0_i32_0 : i32, i32
  }
  func.func @transform_2(%arg0: i32) -> (i32, i32) {
    %c0_i32 = arith.constant 0 : i32
    %c0_i32_0 = arith.constant 0 : i32
    return %arg0, %c0_i32 : i32, i32
  }
}

</mosaic_0001>

<bundles_post_ra>
// kernel: tpu_custom_call.1
= control target key start
LH: loop header
LB: loop body
LE: loop exit
PB: predicated region body
PF: predicated region fallthrough
CT: control target
= control target key end

     0   :  { %7 = vsyncpa [#allocation3], 0  ;;  %s298_s0 = inlined_call_operand.hbm [shape: f32[8,128], index: 0, kind: input, shape index: {}]   ;;  %s299_s1 = inlined_call_operand.hbm [shape: f32[128,128], index: 1, kind: input, shape index: {}]   ;;  %s300_s2 = inlined_call_operand.hbm [shape: f32[8,128], index: 2, kind: output, shape index: {}]  }
   0x1   :  { %8 = vsyncpa [#allocation6], 0 }
   0x2   :  { %9 = vsyncpa [#allocation4], 0  ;;  %s267_s9 = smov [#allocation2]   ;;  %s268_s11 = smov [#allocation5]  }
   0x3   :  { %s16_s10 = sshll.u32 %s267_s9, 4  ;;  %s25_s12 = sshll.u32 %s268_s11, 4  ;;  %s17_s10 = int_to_ptr.vmem [resolvable:$true] %s16_s10  ;;  %s26_s12 = int_to_ptr.vmem [resolvable:$true] %s25_s12 }
   0x4   :  { %s209_s13 = scalar_lea.vmem %s17_s10, 128  ;;  %p214_p1 = scmp.lt.s32.totalorder %s17_s10, %s17_s10 }
   0x5   :  { %p210_p0 = scmp.ne.s32.totalorder %s17_s10, %s209_s13  ;;  %p215_p2 = scmp.lt.s32.totalorder %s209_s13, %s209_s13 }
   0x7   :  { %p216_p3 = por %p215_p2, %p214_p1 }
   0x9   :  { %p217_p4 = pnand %p216_p3, %p210_p0 }
   0xb   :  { %220 = shalt.err (!%p217_p4)
}
   0xc   :  { %19 = dma.hbm_to_vmem [thread:$0]  %s298_s0, 128, %s17_s10, [#allocation3]  }
   0xd   :  { %s229_s16 = scalar_lea.vmem %s26_s12, 2048  ;;  %p234_p6 = scmp.lt.s32.totalorder %s26_s12, %s26_s12 }
   0xe   :  { %p230_p5 = scmp.ne.s32.totalorder %s26_s12, %s229_s16  ;;  %p235_p7 = scmp.lt.s32.totalorder %s229_s16, %s229_s16 }
  0x10   :  { %p236_p8 = por %p235_p7, %p234_p6 }
  0x12   :  { %p237_p9 = pnand %p236_p8, %p230_p5 }
  0x14   :  { %240 = shalt.err (!%p237_p9)
}
  0x15   :  { %s269_s17 = smov 128   ;;  %s270_s18 = smov 8  }
  0x16   :  { %31 = dma.hbm_to_vmem [thread:$0]  %s299_s1, 2048, %s26_s12, [#allocation6], %s269_s17, %s269_s17, %s270_s18  }
  0x17   :  { %261 = dma.done.wait [#allocation3], 128  }
  0x18   :  { %262 = vsyncadd [#allocation3], 4294967168 }
  0x19   :  { %263 = dma.done.wait [#allocation6], 2048  }
  0x1a   :  { %264 = vsyncadd [#allocation6], 4294965248  ;;  %v271_v0 = vmov 0.0   ;;  %vm272_vm0 = vmmov 0   ;;  %v54_v1 = vld [vmem:[#allocation5 + $0x78] sm:$0xff]  ;;  %v53_v2 = vld [vmem:[#allocation5 + $0x70] sm:$0xff] }
  0x1b   :  { %159 = vmatprep.subr.mxu0 %v271_v0  ;;  %191 = vmatprep.mubr.msk.f32.mxu0 %vm272_vm0, %v271_v0  ;;  %v52_v3 = vld [vmem:[#allocation5 + $0x68] sm:$0xff]  ;;  %v51_v4 = vld [vmem:[#allocation5 + $0x60] sm:$0xff]  ;;  %v50_v5 = vld [vmem:[#allocation5 + $0x58] sm:$0xff]  ;;  %s273_s0 = smov [#allocation7]  }
  0x1c   :  { %160 = vmatpush3.msra.mxu0 %v54_v1  ;;  %v49_v6 = vld [vmem:[#allocation5 + $0x50] sm:$0xff]  ;;  %v48_v7 = vld [vmem:[#allocation5 + $0x48] sm:$0xff]  ;;  %v47_v8 = vld [vmem:[#allocation5 + $0x40] sm:$0xff]  ;;  %s132_s1 = sshll.u32 %s273_s0, 4  ;;  %s133_s1 = int_to_ptr.vmem [resolvable:$true] %s132_s1 }
  0x1d   :  { %161 = vmatprep.subr.mxu0 %v271_v0  ;;  %v46_v9 = vld [vmem:[#allocation5 + $0x38] sm:$0xff]  ;;  %v45_v10 = vld [vmem:[#allocation5 + $0x30] sm:$0xff]  ;;  %v44_v11 = vld [vmem:[#allocation5 + $0x28] sm:$0xff]  ;;  %s241_s21 = scalar_lea.vmem %s133_s1, 128  ;;  %p246_p11 = scmp.lt.s32.totalorder %s133_s1, %s133_s1 }
  0x1e   :  { %162 = vmatpush3.msra.mxu0 %v53_v2  ;;  %v43_v12 = vld [vmem:[#allocation5 + $0x20] sm:$0xff]  ;;  %v42_v13 = vld [vmem:[#allocation5 + $0x18] sm:$0xff]  ;;  %v41_v14 = vld [vmem:[#allocation5 + $0x10] sm:$0xff]  ;;  %p242_p10 = scmp.ne.s32.totalorder %s133_s1, %s241_s21  ;;  %p247_p12 = scmp.lt.s32.totalorder %s241_s21, %s241_s21 }
  0x1f   :  { %163 = vmatprep.subr.mxu0 %v271_v0  ;;  %v40_v15 = vld [vmem:[#allocation5 + $0x8] sm:$0xff]  ;;  %v39_v16 = vld [vmem:[#allocation5] sm:$0xff]  ;;  %v38_v17 = vld [vmem:[#allocation2] sm:$0xff] }
  0x20   :  { %164 = vmatpush3.msra.mxu0 %v52_v3  ;;  %p248_p13 = por %p247_p12, %p246_p11 }
  0x21   :  { %165 = vmatprep.subr.mxu0 %v271_v0 }
  0x22   :  { %166 = vmatpush3.msra.mxu0 %v51_v4  ;;  %p249_p0 = pnand %p248_p13, %p242_p10 }
  0x23   :  { %167 = vmatprep.subr.mxu0 %v271_v0 }
  0x24   :  { %168 = vmatpush3.msra.mxu0 %v50_v5 }
  0x25   :  { %169 = vmatprep.subr.mxu0 %v271_v0 }
  0x26   :  { %170 = vmatpush3.msra.mxu0 %v49_v6 }
  0x27   :  { %171 = vmatprep.subr.mxu0 %v271_v0 }
  0x28   :  { %172 = vmatpush3.msra.mxu0 %v48_v7 }
  0x29   :  { %173 = vmatprep.subr.mxu0 %v271_v0 }
  0x2a   :  { %174 = vmatpush3.msra.mxu0 %v47_v8 }
  0x2b   :  { %175 = vmatprep.subr.mxu0 %v271_v0 }
  0x2c   :  { %176 = vmatpush3.msra.mxu0 %v46_v9 }
  0x2d   :  { %177 = vmatprep.subr.mxu0 %v271_v0 }
  0x2e   :  { %178 = vmatpush3.msra.mxu0 %v45_v10 }
  0x2f   :  { %179 = vmatprep.subr.mxu0 %v271_v0 }
  0x30   :  { %180 = vmatpush3.msra.mxu0 %v44_v11 }
  0x31   :  { %181 = vmatprep.subr.mxu0 %v271_v0 }
  0x32   :  { %182 = vmatpush3.msra.mxu0 %v43_v12 }
  0x33   :  { %183 = vmatprep.subr.mxu0 %v271_v0 }
  0x34   :  { %184 = vmatpush3.msra.mxu0 %v42_v13 }
  0x35   :  { %185 = vmatprep.subr.mxu0 %v271_v0 }
  0x36   :  { %186 = vmatpush3.msra.mxu0 %v41_v14 }
  0x37   :  { %187 = vmatprep.subr.mxu0 %v271_v0 }
  0x38   :  { %188 = vmatpush3.msra.mxu0 %v40_v15 }
  0x39   :  { %189 = vmatprep.subr.mxu0 %v271_v0 }
  0x3a   :  { %190 = vmatpush3.msra.mxu0 %v39_v16 }
  0x3b   :  { %192 = vmatmul.mubr.f32.vlgmr.msra.gmra.mxu0 %v38_v17 }
  0xfb   :  { %v121_v18 = vpop.f32.mrf.mxu0 }
  0xfc   :  { %125 = vst [vmem:[#allocation7] sm:$0xff] %v121_v18 }
  0xfd   :  { %v193_v19 = vpop.f32.mrf.mxu0 }
  0xfe   :  { %252 = shalt.err (!%p249_p0)
}
  0xff   :  { %135 = dma.vmem_to_hbm [thread:$0]  %s133_s1, 128, %s300_s2, [#allocation4]  }
 0x100   :  { %265 = dma.done.wait [#allocation4], 128  }
 0x101   :  { %266 = vsyncadd [#allocation4], 4294967168 }
 0x102   :  { %139 = vsyncpa [#allocation3], 1 }
 0x103   :  { %140 = vsyncpa [#allocation6], 1 }
 0x104   :  { %141 = vsyncpa [#allocation4], 1 }

</bundles_post_ra>
